<compile_context>
chip_gen: v7x
topology: tpu7x:2x2x1
jax: 0.10.0
libtpu: 0.0.40
codegen_flags: <defaults>
</compile_context>

<pallas_src>
import jax
import jax.numpy as jnp
from jax.experimental import pallas as pl
from jax.experimental.pallas import tpu as pltpu

D_IN = 784  # fixed by lin1 in the PyTorch module


def _round_up(x, m):
    return ((x + m - 1) // m) * m


def _mlp_kernel(x_ref, w1_ref, w2_ref, w3_ref, o_ref):
    # x_ref: (TB, 784) bf16 tile; weights are full VMEM-resident bf16 blocks.
    x = x_ref[...]
    h1 = jnp.dot(x, w1_ref[...], preferred_element_type=jnp.float32)   # (TB, Hp) f32
    h1 = jnp.maximum(h1, 0.0).astype(w2_ref.dtype)                     # relu, back to bf16
    h2 = jnp.dot(h1, w2_ref[...], preferred_element_type=jnp.float32)  # (TB, Hp) f32
    h2 = jnp.maximum(h2, 0.0).astype(w3_ref.dtype)                     # relu, back to bf16
    # dropout: identity in eval mode
    y = jnp.dot(h2, w3_ref[...], preferred_element_type=jnp.float32)   # (TB, Op) f32
    o_ref[...] = y.astype(o_ref.dtype)


def prepare_weights(w1, w2, w3, dtype=jnp.bfloat16):
    """One-time weight preprocessing (call once when weights are created/loaded).

    Transposes PyTorch (out, in) layouts to (in, out), zero-pads the hidden and
    output lane dimensions up to multiples of 128, and casts to `dtype`.
    Zero padding is semantics-preserving: padded hidden units are always 0
    (relu(0)=0) and padded output columns are sliced off in the wrapper.
    """
    H = w1.shape[0]
    O = w3.shape[0]
    Hp = _round_up(max(H, 128), 128)
    Op = _round_up(max(O, 128), 128)
    w1t = jnp.zeros((D_IN, Hp), dtype).at[:, :H].set(jnp.asarray(w1, dtype).T)
    w2t = jnp.zeros((Hp, Hp), dtype).at[:H, :H].set(jnp.asarray(w2, dtype).T)
    w3t = jnp.zeros((Hp, Op), dtype).at[:H, :O].set(jnp.asarray(w3, dtype).T)
    return w1t, w2t, w3t, O


def mlpnet_forward(x, w1t, w2t, w3t, n_outputs, *, block_b=256):
    """Fused forward of MLPNet (eval mode).

    Args:
      x:   (B, 784) float array.
      w1t: (784, Hp)  pre-transposed/padded/cast lin1 weight (from prepare_weights).
      w2t: (Hp, Hp)   pre-transposed/padded/cast lin2 weight.
      w3t: (Hp, Op)   pre-transposed/padded/cast fc1 weight.
      n_outputs: true (unpadded) number of outputs.
    Returns:
      (B, n_outputs) float32.
    """
    B = x.shape[0]
    Hp = w1t.shape[1]
    Op = w3t.shape[1]
    dtype = w1t.dtype

    # Batch tile: multiple of 8; smaller for very large hidden dims so the
    # (TB, Hp) f32 intermediates don't blow up VMEM / load-store slots.
    tb = 128 if Hp >= 2048 else block_b
    tb = min(tb, _round_up(B, 8))
    tb = max(8, _round_up(tb, 8))
    Bp = _round_up(B, tb)

    # Pad the batch and cast the input at the pallas_call boundary.
    xb = jnp.zeros((Bp, D_IN), dtype).at[:B].set(jnp.asarray(x, dtype))

    grid = (Bp // tb,)

    flops = 2 * Bp * (D_IN * Hp + Hp * Hp + Hp * Op)
    bytes_accessed = int(
        Bp * D_IN * xb.dtype.itemsize
        + w1t.size * w1t.dtype.itemsize
        + w2t.size * w2t.dtype.itemsize
        + w3t.size * w3t.dtype.itemsize
        + Bp * Op * 4
    )

    grid_spec = pltpu.PrefetchScalarGridSpec(
        num_scalar_prefetch=0,
        grid=grid,
        in_specs=[
            pl.BlockSpec((tb, D_IN), lambda i: (i, 0)),   # x tiles stream over batch
            pl.BlockSpec((D_IN, Hp), lambda i: (0, 0)),   # weights: same block every
            pl.BlockSpec((Hp, Hp),   lambda i: (0, 0)),   # step -> stay VMEM-resident
            pl.BlockSpec((Hp, Op),   lambda i: (0, 0)),
        ],
        out_specs=pl.BlockSpec((tb, Op), lambda i: (i, 0)),
    )

    out_padded = pl.pallas_call(
        _mlp_kernel,
        out_shape=jax.ShapeDtypeStruct((Bp, Op), jnp.float32),
        grid_spec=grid_spec,
        compiler_params=pltpu.CompilerParams(
            dimension_semantics=("parallel",)),
        cost_estimate=pl.CostEstimate(
            flops=flops, transcendentals=0, bytes_accessed=bytes_accessed),
    )(xb, w1t, w2t, w3t)

    return out_padded[:B, :n_outputs]


if __name__ == "__main__":
    # Small deterministic example consistent with the module:
    # input dim fixed at 784 by lin1; small hidden / output sizes.
    B = 8
    N_HIDDEN = 32
    N_OUTPUTS = 10

    key = jax.random.PRNGKey(0)
    kx, k1, k2, k3 = jax.random.split(key, 4)

    x = jax.random.normal(kx, (B, D_IN), dtype=jnp.float32)
    # Deterministic synthetic weights in PyTorch (out, in) layout.
    w1 = jax.random.uniform(k1, (N_HIDDEN, D_IN), jnp.float32,
                            minval=-1.0, maxval=1.0) / jnp.sqrt(D_IN)
    w2 = jax.random.uniform(k2, (N_HIDDEN, N_HIDDEN), jnp.float32,
                            minval=-1.0, maxval=1.0) / jnp.sqrt(N_HIDDEN)
    w3 = jax.random.uniform(k3, (N_OUTPUTS, N_HIDDEN), jnp.float32,
                            minval=-1.0, maxval=1.0) / jnp.sqrt(N_HIDDEN)

    # One-time weight preparation (transpose + pad + bf16 cast), then forward.
    w1t, w2t, w3t, n_out = prepare_weights(w1, w2, w3)
    out = mlpnet_forward(x, w1t, w2t, w3t, n_out)
    out = jax.block_until_ready(out)

    # Pure-JAX f32 reference (eval-mode semantics). Kernel uses bf16 operands
    # with f32 accumulation, so compare with a loosened tolerance.
    h1 = jnp.maximum(x @ w1.T, 0.0)
    h2 = jnp.maximum(h1 @ w2.T, 0.0)
    ref = h2 @ w3.T

    assert out.shape == (B, N_OUTPUTS)
    assert jnp.allclose(out, ref, atol=3e-2, rtol=3e-2), (
        float(jnp.max(jnp.abs(out - ref))))

    print("KERNEL_OK")
</pallas_src>

<mosaic_0001>
module attributes {stable_mosaic.version = 11 : i64} {
  func.func @_mlp_kernel(%arg0: i32, %arg1: memref<8x784xbf16, #tpu.memory_space<vmem>>, %arg2: memref<784x128xbf16, #tpu.memory_space<vmem>>, %arg3: memref<128x128xbf16, #tpu.memory_space<vmem>>, %arg4: memref<128x128xbf16, #tpu.memory_space<vmem>>, %arg5: memref<8x128xf32, #tpu.memory_space<vmem>>) attributes {dimension_semantics = [#tpu.dimension_semantics<parallel>], iteration_bounds = array<i64: 1>, scalar_prefetch = 0 : i64, scratch_operands = 0 : i64, tpu.core_type = #tpu.core_type<tc>, window_params = [{transform_indices = @transform_0, window_bounds = array<i64: 8, 784>}, {pipeline_mode = #tpu.pipeline_mode<synchronous>, transform_indices = @transform_1, window_bounds = array<i64: 784, 128>}, {pipeline_mode = #tpu.pipeline_mode<synchronous>, transform_indices = @transform_2, window_bounds = array<i64: 128, 128>}, {pipeline_mode = #tpu.pipeline_mode<synchronous>, transform_indices = @transform_3, window_bounds = array<i64: 128, 128>}, {transform_indices = @transform_4, window_bounds = array<i64: 8, 128>}]} {
    %c0 = arith.constant 0 : index
    %c0_0 = arith.constant 0 : index
    %0 = vector.load %arg1[%c0, %c0_0] : memref<8x784xbf16, #tpu.memory_space<vmem>>, vector<8x784xbf16>
    %c0_1 = arith.constant 0 : index
    %c0_2 = arith.constant 0 : index
    %1 = vector.load %arg2[%c0_1, %c0_2] : memref<784x128xbf16, #tpu.memory_space<vmem>>, vector<784x128xbf16>
    %cst = arith.constant dense<0.000000e+00> : vector<8x128xf32>
    %2 = tpu.matmul %0, %1, %cst {dimension_numbers = #tpu.dot_dimension_numbers<[1], [0], [0], [1], [0, 0, 1, 1], [], []>} : vector<8x784xbf16>, vector<784x128xbf16>, vector<8x128xf32> -> vector<8x128xf32>
    %cst_3 = arith.constant 0.000000e+00 : f32
    %3 = vector.broadcast %cst_3 : f32 to vector<8x128xf32>
    %4 = arith.maximumf %2, %3 : vector<8x128xf32>
    %5 = arith.truncf %4 : vector<8x128xf32> to vector<8x128xbf16>
    %c0_4 = arith.constant 0 : index
    %c0_5 = arith.constant 0 : index
    %6 = vector.load %arg3[%c0_4, %c0_5] : memref<128x128xbf16, #tpu.memory_space<vmem>>, vector<128x128xbf16>
    %cst_6 = arith.constant dense<0.000000e+00> : vector<8x128xf32>
    %7 = tpu.matmul %5, %6, %cst_6 {dimension_numbers = #tpu.dot_dimension_numbers<[1], [0], [0], [1], [0, 0, 1, 1], [], []>} : vector<8x128xbf16>, vector<128x128xbf16>, vector<8x128xf32> -> vector<8x128xf32>
    %cst_7 = arith.constant 0.000000e+00 : f32
    %8 = vector.broadcast %cst_7 : f32 to vector<8x128xf32>
    %9 = arith.maximumf %7, %8 : vector<8x128xf32>
    %10 = arith.truncf %9 : vector<8x128xf32> to vector<8x128xbf16>
    %c0_8 = arith.constant 0 : index
    %c0_9 = arith.constant 0 : index
    %11 = vector.load %arg4[%c0_8, %c0_9] : memref<128x128xbf16, #tpu.memory_space<vmem>>, vector<128x128xbf16>
    %cst_10 = arith.constant dense<0.000000e+00> : vector<8x128xf32>
    %12 = tpu.matmul %10, %11, %cst_10 {dimension_numbers = #tpu.dot_dimension_numbers<[1], [0], [0], [1], [0, 0, 1, 1], [], []>} : vector<8x128xbf16>, vector<128x128xbf16>, vector<8x128xf32> -> vector<8x128xf32>
    %c0_11 = arith.constant 0 : index
    %c0_12 = arith.constant 0 : index
    %13 = vector.load %arg5[%c0_11, %c0_12] : memref<8x128xf32, #tpu.memory_space<vmem>>, vector<8x128xf32>
    tpu.vector_store %arg5[%c0_11, %c0_12], %12 {strides = array<i32>} : memref<8x128xf32, #tpu.memory_space<vmem>>, vector<8x128xf32>,
    return
  }
  func.func @transform_0(%arg0: i32) -> (i32, i32) {
    %c0_i32 = arith.constant 0 : i32
    %c0_i32_0 = arith.constant 0 : i32
    return %arg0, %c0_i32 : i32, i32
  }
  func.func @transform_1(%arg0: i32) -> (i32, i32) {
    %c0_i32 = arith.constant 0 : i32
    %c0_i32_0 = arith.constant 0 : i32
    %c0_i32_1 = arith.constant 0 : i32
    return %c0_i32, %c0_i32_0 : i32, i32
  }
  func.func @transform_2(%arg0: i32) -> (i32, i32) {
    %c0_i32 = arith.constant 0 : i32
    %c0_i32_0 = arith.constant 0 : i32
    %c0_i32_1 = arith.constant 0 : i32
    return %c0_i32, %c0_i32_0 : i32, i32
  }
  func.func @transform_3(%arg0: i32) -> (i32, i32) {
    %c0_i32 = arith.constant 0 : i32
    %c0_i32_0 = arith.constant 0 : i32
    %c0_i32_1 = arith.constant 0 : i32
    return %c0_i32, %c0_i32_0 : i32, i32
  }
  func.func @transform_4(%arg0: i32) -> (i32, i32) {
    %c0_i32 = arith.constant 0 : i32
    %c0_i32_0 = arith.constant 0 : i32
    return %arg0, %c0_i32 : i32, i32
  }
}

</mosaic_0001>

<bundles_post_ra>
// kernel: tpu_custom_call.1
= control target key start
LH: loop header
LB: loop body
LE: loop exit
PB: predicated region body
PF: predicated region fallthrough
CT: control target
= control target key end

     0   :  { %9 = vsyncpa [#allocation3], 0  ;;  %s1416_s0 = inlined_call_operand.hbm [shape: bf16[8,784], index: 0, kind: input, shape index: {}]   ;;  %s1417_s1 = inlined_call_operand.hbm [shape: bf16[784,128], index: 1, kind: input, shape index: {}]   ;;  %s1418_s2 = inlined_call_operand.hbm [shape: bf16[128,128], index: 2, kind: input, shape index: {}]   ;;  %s1419_s3 = inlined_call_operand.hbm [shape: bf16[128,128], index: 3, kind: input, shape index: {}]   ;;  %s1420_s4 = inlined_call_operand.hbm [shape: f32[8,128], index: 4, kind: output, shape index: {}]  }
   0x1   :  { %10 = vsyncpa [#allocation6], 0 }
   0x2   :  { %11 = vsyncpa [#allocation9], 0 }
   0x3   :  { %12 = vsyncpa [#allocation4], 0  ;;  %s1290_s15 = smov [#allocation5]   ;;  %s1172_s19 = scalar_lea.hbm %s1417_s1, 6272 }
   0x4   :  { %s28_s16 = sshll.u32 %s1290_s15, 4  ;;  %p1173_p0 = scmp.ne.s32.totalorder %s1417_s1, %s1172_s19  ;;  %s29_s16 = int_to_ptr.vmem [resolvable:$true] %s28_s16 }
   0x5   :  { %p1176_p1 = scmp.lt.u32.totalorder %s1172_s19, %s1417_s1 }
   0x7   :  { %p1178_p2 = pnand %p1176_p1, %p1173_p0 }
   0x9   :  { %1181 = shalt.err (!%p1178_p2)
}
   0xa   :  { %s1182_s24 = scalar_lea.vmem %s29_s16, 6272  ;;  %p1187_p4 = scmp.lt.s32.totalorder %s29_s16, %s29_s16 }
   0xb   :  { %p1183_p3 = scmp.ne.s32.totalorder %s29_s16, %s1182_s24  ;;  %p1188_p5 = scmp.lt.s32.totalorder %s1182_s24, %s1182_s24 }
   0xd   :  { %p1189_p6 = por %p1188_p5, %p1187_p4 }
   0xf   :  { %p1190_p7 = pnand %p1189_p6, %p1183_p3 }
  0x11   :  { %1193 = shalt.err (!%p1190_p7)
}
  0x12   :  { %s1291_s25 = smov 64   ;;  %s1292_s26 = smov 4  }
  0x13   :  { %34 = dma.hbm_to_vmem [thread:$0]  %s1417_s1, 6272, %s29_s16, [#allocation6], %s1291_s25, %s1291_s25, %s1292_s26  }
  0x14   :  { %s1293_s29 = smov [#allocation2]   ;;  %s1294_s5 = smov [#allocation7]  }
  0x15   :  { %s19_s30 = sshll.u32 %s1293_s29, 4  ;;  %s40_s6 = sshll.u32 %s1294_s5, 4  ;;  %s20_s30 = int_to_ptr.vmem [resolvable:$true] %s19_s30  ;;  %s41_s6 = int_to_ptr.vmem [resolvable:$true] %s40_s6 }
  0x16   :  { %s1194_s9 = scalar_lea.hbm %s1416_s0, 448 }
  0x17   :  { %p1195_p8 = scmp.ne.s32.totalorder %s1416_s0, %s1194_s9  ;;  %p1198_p9 = scmp.lt.u32.totalorder %s1194_s9, %s1416_s0 }
  0x19   :  { %p1200_p10 = pnand %p1198_p9, %p1195_p8 }
  0x1b   :  { %1203 = shalt.err (!%p1200_p10)
}
  0x1c   :  { %s1204_s1 = scalar_lea.vmem %s20_s30, 448  ;;  %p1209_p12 = scmp.lt.s32.totalorder %s20_s30, %s20_s30 }
  0x1d   :  { %p1205_p11 = scmp.ne.s32.totalorder %s20_s30, %s1204_s1  ;;  %p1210_p13 = scmp.lt.s32.totalorder %s1204_s1, %s1204_s1 }
  0x1f   :  { %p1211_p0 = por %p1210_p13, %p1209_p12 }
  0x21   :  { %p1212_p1 = pnand %p1211_p0, %p1205_p11 }
  0x23   :  { %1215 = shalt.err (!%p1212_p1)
}
  0x24   :  { %22 = dma.hbm_to_vmem [thread:$0]  %s1416_s0, 448, %s20_s30, [#allocation3]  }
  0x25   :  { %s1216_s18 = scalar_lea.hbm %s1418_s2, 1024 }
  0x26   :  { %p1217_p2 = scmp.ne.s32.totalorder %s1418_s2, %s1216_s18  ;;  %p1220_p3 = scmp.lt.u32.totalorder %s1216_s18, %s1418_s2 }
  0x28   :  { %p1222_p4 = pnand %p1220_p3, %p1217_p2 }
  0x2a   :  { %1225 = shalt.err (!%p1222_p4)
}
  0x2b   :  { %s1226_s23 = scalar_lea.vmem %s41_s6, 1024  ;;  %p1231_p6 = scmp.lt.s32.totalorder %s41_s6, %s41_s6 }
  0x2c   :  { %p1227_p5 = scmp.ne.s32.totalorder %s41_s6, %s1226_s23  ;;  %p1232_p7 = scmp.lt.s32.totalorder %s1226_s23, %s1226_s23 }
  0x2e   :  { %p1233_p8 = por %p1232_p7, %p1231_p6 }
  0x30   :  { %p1234_p9 = pnand %p1233_p8, %p1227_p5 }
  0x32   :  { %1237 = shalt.err (!%p1234_p9)
}
  0x33   :  { %46 = dma.hbm_to_vmem [thread:$0]  %s1418_s2, 1024, %s41_s6, [#allocation6], %s1291_s25, %s1291_s25, %s1292_s26  }
  0x34   :  { %s1295_s27 = smov [#allocation8]   ;;  %s1238_s5 = scalar_lea.hbm %s1419_s3, 1024 }
  0x35   :  { %s52_s28 = sshll.u32 %s1295_s27, 4  ;;  %p1239_p10 = scmp.ne.s32.totalorder %s1419_s3, %s1238_s5  ;;  %s53_s28 = int_to_ptr.vmem [resolvable:$true] %s52_s28 }
  0x36   :  { %p1242_p11 = scmp.lt.u32.totalorder %s1238_s5, %s1419_s3 }
  0x38   :  { %p1244_p12 = pnand %p1242_p11, %p1239_p10 }
  0x3a   :  { %1247 = shalt.err (!%p1244_p12)
}
  0x3b   :  { %s1248_s11 = scalar_lea.vmem %s53_s28, 1024  ;;  %p1253_p0 = scmp.lt.s32.totalorder %s53_s28, %s53_s28 }
  0x3c   :  { %p1249_p13 = scmp.ne.s32.totalorder %s53_s28, %s1248_s11  ;;  %p1254_p1 = scmp.lt.s32.totalorder %s1248_s11, %s1248_s11 }
  0x3e   :  { %p1255_p2 = por %p1254_p1, %p1253_p0 }
  0x40   :  { %p1256_p3 = pnand %p1255_p2, %p1249_p13 }
  0x42   :  { %1259 = shalt.err (!%p1256_p3)
}
  0x43   :  { %58 = dma.hbm_to_vmem [thread:$0]  %s1419_s3, 1024, %s53_s28, [#allocation9], %s1291_s25, %s1291_s25, %s1292_s26  }
  0x44   :  { %1282 = dma.done.wait [#allocation3], 448  }
  0x45   :  { %1283 = vsyncadd [#allocation3], 4294966848 }
  0x46   :  { %1284 = dma.done.wait [#allocation6], 7296  }
  0x47   :  { %1285 = vsyncadd [#allocation6], 4294960000 }
  0x48   :  { %1286 = dma.done.wait [#allocation9], 1024  }
  0x49   :  { %1287 = vsyncadd [#allocation9], 4294966272  ;;  %v1100_v0 = vld [vmem:[#allocation5 + $0x40] sm:$0xff]   ;;  %v1104_v4 = vld [vmem:[#allocation5 + $0x48] sm:$0xff]   ;;  %v1296_v40 = vmov 0.0   ;;  %vm1297_vm0 = vmmov 0  }
  0x4a   :  { %v1101_v1 = vld [vmem:[#allocation5 + $0xc0] sm:$0xff]   ;;  %959 = vmatprep.subr.bf16.mxu0 %v1100_v0  ;;  %v1105_v5 = vld [vmem:[#allocation5 + $0xc8] sm:$0xff]   ;;  %v1108_v8 = vld [vmem:[#allocation5 + $0x50] sm:$0xff]   ;;  %vm492_vm1 = vcmask 130048   ;;  %s1298_s3 = smov [#allocation10]  }
  0x4b   :  { %v1102_v2 = vld [vmem:[#allocation5] sm:$0xff]   ;;  %981 = vmatprep.subr.bf16.mxu1 %v1101_v1  ;;  %v1106_v6 = vld [vmem:[#allocation5 + $0x8] sm:$0xff]   ;;  %v1109_v9 = vld [vmem:[#allocation5 + $0xd0] sm:$0xff]   ;;  %s875_s25 = sshll.u32 %s1298_s3, 4  ;;  %s876_s25 = int_to_ptr.vmem [resolvable:$true] %s875_s25 }
  0x4c   :  { %v1103_v3 = vld [vmem:[#allocation5 + $0x80] sm:$0xff]   ;;  %960 = vmatpush3.bf16.msra.mxu0 %v1102_v2  ;;  %v1107_v7 = vld [vmem:[#allocation5 + $0x88] sm:$0xff]   ;;  %v1110_v10 = vld [vmem:[#allocation5 + $0x10] sm:$0xff]   ;;  %s1260_s26 = scalar_lea.vmem %s876_s25, 128  ;;  %p1265_p5 = scmp.lt.s32.totalorder %s876_s25, %s876_s25 }
  0x4d   :  { %982 = vmatpush3.bf16.msra.mxu1 %v1103_v3  ;;  %961 = vmatprep.subr.bf16.mxu0 %v1104_v4  ;;  %v1111_v11 = vld [vmem:[#allocation5 + $0x90] sm:$0xff]   ;;  %v1112_v12 = vld [vmem:[#allocation5 + $0x58] sm:$0xff]   ;;  %v1116_v16 = vld [vmem:[#allocation5 + $0x60] sm:$0xff]   ;;  %p1261_p4 = scmp.ne.s32.totalorder %s876_s25, %s1260_s26  ;;  %p1266_p6 = scmp.lt.s32.totalorder %s1260_s26, %s1260_s26 }
  0x4e   :  { %983 = vmatprep.subr.bf16.mxu1 %v1105_v5  ;;  %v1113_v13 = vld [vmem:[#allocation5 + $0xd8] sm:$0xff]   ;;  %v1117_v17 = vld [vmem:[#allocation5 + $0xe0] sm:$0xff]   ;;  %v1120_v20 = vld [vmem:[#allocation5 + $0x68] sm:$0xff]  }
  0x4f   :  { %v1114_v14 = vld [vmem:[#allocation5 + $0x18] sm:$0xff]   ;;  %v1118_v18 = vld [vmem:[#allocation5 + $0x20] sm:$0xff]   ;;  %v1121_v21 = vld [vmem:[#allocation5 + $0xe8] sm:$0xff]   ;;  %p1267_p7 = por %p1266_p6, %p1265_p5 }
  0x50   :  { %962 = vmatpush3.bf16.msra.mxu0 %v1106_v6  ;;  %v1115_v15 = vld [vmem:[#allocation5 + $0x98] sm:$0xff]   ;;  %v1119_v19 = vld [vmem:[#allocation5 + $0xa0] sm:$0xff]   ;;  %v1122_v22 = vld [vmem:[#allocation5 + $0x28] sm:$0xff]  }
  0x51   :  { %984 = vmatpush3.bf16.msra.mxu1 %v1107_v7  ;;  %963 = vmatprep.subr.bf16.mxu0 %v1108_v8  ;;  %v1123_v23 = vld [vmem:[#allocation5 + $0xa8] sm:$0xff]   ;;  %v1124_v24 = vld [vmem:[#allocation5 + $0x70] sm:$0xff]   ;;  %v1128_v28 = vld [vmem:[#allocation5 + $0x78] sm:$0xff]   ;;  %p1268_p8 = pnand %p1267_p7, %p1261_p4 }
  0x52   :  { %985 = vmatprep.subr.bf16.mxu1 %v1109_v9  ;;  %v1125_v25 = vld [vmem:[#allocation5 + $0xf0] sm:$0xff]   ;;  %v1129_v29 = vld [vmem:[#allocation5 + $0xf8] sm:$0xff]   ;;  %v72_v32 = vld [vmem:[#allocation2] sm:$0xff] }
  0x53   :  { %v1126_v26 = vld [vmem:[#allocation5 + $0x30] sm:$0xff]   ;;  %v1130_v30 = vld [vmem:[#allocation5 + $0x38] sm:$0xff]   ;;  %v886_v34 = vcombine.low %v72_v32, %v72_v32  ;;  %v887_v35 = vcombine.high %v72_v32, %v72_v32  ;;  %v1136_v38 = vld [vmem:[#allocation5 + $0x140] sm:$0xff]  }
  0x54   :  { %964 = vmatpush3.bf16.msra.mxu0 %v1110_v10  ;;  %v1127_v27 = vld [vmem:[#allocation5 + $0xb0] sm:$0xff]   ;;  %v1131_v31 = vld [vmem:[#allocation5 + $0xb8] sm:$0xff]   ;;  %v1137_v39 = vld [vmem:[#allocation5 + $0x100] sm:$0xff]  }
  0x55   :  { %986 = vmatpush3.bf16.msra.mxu1 %v1111_v11  ;;  %965 = vmatprep.subr.bf16.mxu0 %v1112_v12  ;;  %v73_v33 = vld [vmem:[#allocation2 + $0x8] sm:$0xff]  ;;  %v1142_v45 = vld [vmem:[#allocation5 + $0x158] sm:$0xff]   ;;  %v1144_v47 = vld [vmem:[#allocation5 + $0x160] sm:$0xff]  }
  0x56   :  { %987 = vmatprep.subr.bf16.mxu1 %v1113_v13  ;;  %v888_v36 = vcombine.low %v73_v33, %v73_v33  ;;  %v889_v37 = vcombine.high %v73_v33, %v73_v33  ;;  %528 = vmatprep.mubr.bf16.mxu0 %v887_v35  ;;  %v1138_v41 = vld [vmem:[#allocation5 + $0x148] sm:$0xff]   ;;  %v1140_v43 = vld [vmem:[#allocation5 + $0x150] sm:$0xff]   ;;  %v1143_v46 = vld [vmem:[#allocation5 + $0x118] sm:$0xff]  }
  0x57   :  { %v1139_v42 = vld [vmem:[#allocation5 + $0x108] sm:$0xff]   ;;  %v1141_v44 = vld [vmem:[#allocation5 + $0x110] sm:$0xff]   ;;  %v1145_v48 = vld [vmem:[#allocation5 + $0x120] sm:$0xff]  }
  0x58   :  { %966 = vmatpush3.bf16.msra.mxu0 %v1114_v14  ;;  %568 = vmatprep.mubr.bf16.mxu1 %v889_v37  ;;  %v1146_v49 = vld [vmem:[#allocation5 + $0x168] sm:$0xff]   ;;  %v1152_v50 = vld [vmem:[#allocation5 + $0x180] sm:$0xff]   ;;  %v74_v51 = vld [vmem:[#allocation2 + $0x10] sm:$0xff] }
  0x59   :  { %988 = vmatpush3.bf16.msra.mxu1 %v1115_v15  ;;  %967 = vmatprep.subr.bf16.mxu0 %v1116_v16  ;;  %v891_v52 = vcombine.high %v74_v51, %v74_v51  ;;  %v1155_v53 = vld [vmem:[#allocation2 + $0x18] ss:$0 sps:$4 sm:$0xff]   ;;  %v1147_v54 = vld [vmem:[#allocation5 + $0x128] sm:$0xff]   ;;  %v1148_v55 = vld [vmem:[#allocation5 + $0x170] sm:$0xff]   ;;  %v890_v59 = vcombine.low %v74_v51, %v74_v51 }
  0x5a   :  { %989 = vmatprep.subr.bf16.mxu1 %v1117_v17  ;;  %v1149_v56 = vld [vmem:[#allocation5 + $0x130] sm:$0xff]   ;;  %v1150_v57 = vld [vmem:[#allocation5 + $0x178] sm:$0xff]   ;;  %v1156_v60 = vld [vmem:[#allocation7] sm:$0xff]  }
  0x5b   :  { %v1151_v58 = vld [vmem:[#allocation5 + $0x138] sm:$0xff]   ;;  %v1157_v61 = vld [vmem:[#allocation7 + $0x8] sm:$0xff]   ;;  %v1159_v63 = vld [vmem:[#allocation7 + $0x18] sm:$0xff]  }
  0x5c   :  { %968 = vmatpush3.bf16.msra.mxu0 %v1118_v18  ;;  %v1158_v62 = vld [vmem:[#allocation7 + $0x10] sm:$0xff]   ;;  %v1160_v0 = vld [vmem:[#allocation7 + $0x20] sm:$0xff]   ;;  %v1161_v1 = vld [vmem:[#allocation7 + $0x28] sm:$0xff]  }
  0x5d   :  { %990 = vmatpush3.bf16.msra.mxu1 %v1119_v19  ;;  %969 = vmatprep.subr.bf16.mxu0 %v1120_v20  ;;  %v1162_v2 = vld [vmem:[#allocation7 + $0x30] sm:$0xff]   ;;  %v1163_v3 = vld [vmem:[#allocation7 + $0x38] sm:$0xff]   ;;  %v1164_v4 = vld [vmem:[#allocation8] sm:$0xff]  }
  0x5e   :  { %991 = vmatprep.subr.bf16.mxu1 %v1121_v21  ;;  %v1165_v5 = vld [vmem:[#allocation8 + $0x8] sm:$0xff]   ;;  %v1166_v6 = vld [vmem:[#allocation8 + $0x10] sm:$0xff]   ;;  %v1167_v7 = vld [vmem:[#allocation8 + $0x18] sm:$0xff]  }
  0x5f   :  { %v1168_v8 = vld [vmem:[#allocation8 + $0x20] sm:$0xff]   ;;  %v1169_v9 = vld [vmem:[#allocation8 + $0x28] sm:$0xff]   ;;  %v1170_v10 = vld [vmem:[#allocation8 + $0x30] sm:$0xff]  }
  0x60   :  { %970 = vmatpush3.bf16.msra.mxu0 %v1122_v22  ;;  %v1171_v35 = vld [vmem:[#allocation8 + $0x38] sm:$0xff]  }
  0x61   :  { %992 = vmatpush3.bf16.msra.mxu1 %v1123_v23  ;;  %971 = vmatprep.subr.bf16.mxu0 %v1124_v24 }
  0x62   :  { %993 = vmatprep.subr.bf16.mxu1 %v1125_v25 }
  0x64   :  { %972 = vmatpush3.bf16.msra.mxu0 %v1126_v26 }
  0x65   :  { %994 = vmatpush3.bf16.msra.mxu1 %v1127_v27  ;;  %973 = vmatprep.subr.bf16.mxu0 %v1128_v28 }
  0x66   :  { %995 = vmatprep.subr.bf16.mxu1 %v1129_v29 }
  0x68   :  { %974 = vmatpush3.bf16.msra.mxu0 %v1130_v30 }
  0x69   :  { %996 = vmatpush3.bf16.msra.mxu1 %v1131_v31  ;;  %1003 = vmatprep.subr.bf16.mxu0 %v1136_v38 }
  0x6a   :  { %1045 = vmatprep.subr.bf16.mxu1 %v1296_v40 }
  0x6b   :  { %529 = vmatmul.mubr.bf16.vlgmr.msra.gmra.mrb[0].mxu0 %v886_v34 }
  0x6c   :  { %569 = vmatmul.mubr.bf16.vlgmr.msra.gmra.mrb[0].mxu1 %v888_v36  ;;  %1004 = vmatpush3.bf16.msra.mxu0 %v1137_v39 }
  0x6d   :  { %1047 = vmatprep.mubr.msk.bf16.mxu1 %vm1297_vm0, %v1296_v40  ;;  %1005 = vmatprep.subr.bf16.mxu0 %v1138_v41 }
  0x6e   :  { %1046 = vmatpush3.bf16.msra.mxu1 %v1152_v50  ;;  %608 = vmatprep.mubr.bf16.mxu0 %v891_v52 }
  0x6f   :  { %1051 = vmatprep.subr.bf16.mxu1 %v1296_v40 }
  0x70   :  { %1006 = vmatpush3.bf16.msra.mxu0 %v1139_v42 }
  0x71   :  { %1007 = vmatprep.subr.bf16.mxu0 %v1140_v43 }
  0x74   :  { %1008 = vmatpush3.bf16.msra.mxu0 %v1141_v44  ;;  %1048 = vmatmul.mubr.msk.bf16.vlgmr.msra.gmra.mrb[4].mxu1 %vm492_vm1, %v1155_v53 }
  0x75   :  { %1009 = vmatprep.subr.bf16.mxu0 %v1142_v45  ;;  %1067 = vmatprep.mubr.msk.bf16.mxu1 %vm1297_vm0, %v1296_v40 }
  0x76   :  { %1052 = vmatpush3.bf16.msra.mxu1 %v1156_v60 }
  0x77   :  { %1053 = vmatprep.subr.bf16.mxu1 %v1296_v40 }
  0x78   :  { %1010 = vmatpush3.bf16.msra.mxu0 %v1143_v46 }
  0x79   :  { %1011 = vmatprep.subr.bf16.mxu0 %v1144_v47 }
  0x7a   :  { %1054 = vmatpush3.bf16.msra.mxu1 %v1157_v61 }
  0x7b   :  { %1055 = vmatprep.subr.bf16.mxu1 %v1296_v40 }
  0x7c   :  { %1012 = vmatpush3.bf16.msra.mxu0 %v1145_v48 }
  0x7d   :  { %1013 = vmatprep.subr.bf16.mxu0 %v1146_v49 }
  0x7e   :  { %1056 = vmatpush3.bf16.msra.mxu1 %v1158_v62 }
  0x7f   :  { %1057 = vmatprep.subr.bf16.mxu1 %v1296_v40 }
  0x80   :  { %1014 = vmatpush3.bf16.msra.mxu0 %v1147_v54 }
  0x81   :  { %1015 = vmatprep.subr.bf16.mxu0 %v1148_v55 }
  0x82   :  { %1058 = vmatpush3.bf16.msra.mxu1 %v1159_v63 }
  0x83   :  { %1059 = vmatprep.subr.bf16.mxu1 %v1296_v40 }
  0x84   :  { %1016 = vmatpush3.bf16.msra.mxu0 %v1149_v56 }
  0x85   :  { %1017 = vmatprep.subr.bf16.mxu0 %v1150_v57 }
  0x86   :  { %1060 = vmatpush3.bf16.msra.mxu1 %v1160_v0 }
  0x87   :  { %1061 = vmatprep.subr.bf16.mxu1 %v1296_v40 }
  0x88   :  { %1018 = vmatpush3.bf16.msra.mxu0 %v1151_v58 }
  0x89   :  { %1071 = vmatprep.subr.bf16.mxu0 %v1296_v40 }
  0x8a   :  { %1062 = vmatpush3.bf16.msra.mxu1 %v1161_v1 }
  0x8b   :  { %609 = vmatmul.mubr.bf16.vlgmr.msra.gmra.mrb[4].mxu0 %v890_v59  ;;  %1063 = vmatprep.subr.bf16.mxu1 %v1296_v40 }
  0x8c   :  { %1087 = vmatprep.mubr.msk.bf16.mxu0 %vm1297_vm0, %v1296_v40  ;;  %1072 = vmatpush3.bf16.msra.mxu0 %v1164_v4 }
  0x8d   :  { %1073 = vmatprep.subr.bf16.mxu0 %v1296_v40 }
  0x8e   :  { %1064 = vmatpush3.bf16.msra.mxu1 %v1162_v2 }
  0x8f   :  { %1065 = vmatprep.subr.bf16.mxu1 %v1296_v40 }
  0x90   :  { %1074 = vmatpush3.bf16.msra.mxu0 %v1165_v5 }
  0x91   :  { %1075 = vmatprep.subr.bf16.mxu0 %v1296_v40 }
  0x92   :  { %1066 = vmatpush3.bf16.msra.mxu1 %v1163_v3 }
  0x94   :  { %1076 = vmatpush3.bf16.msra.mxu0 %v1166_v6 }
  0x95   :  { %1077 = vmatprep.subr.bf16.mxu0 %v1296_v40 }
  0x98   :  { %1078 = vmatpush3.bf16.msra.mxu0 %v1167_v7 }
  0x99   :  { %1079 = vmatprep.subr.bf16.mxu0 %v1296_v40 }
  0x9c   :  { %1080 = vmatpush3.bf16.msra.mxu0 %v1168_v8 }
  0x9d   :  { %1081 = vmatprep.subr.bf16.mxu0 %v1296_v40 }
  0xa0   :  { %1082 = vmatpush3.bf16.msra.mxu0 %v1169_v9 }
  0xa1   :  { %1083 = vmatprep.subr.bf16.mxu0 %v1296_v40 }
  0xa4   :  { %1084 = vmatpush3.bf16.msra.mxu0 %v1170_v10 }
  0xa5   :  { %1085 = vmatprep.subr.bf16.mxu0 %v1296_v40 }
  0xa8   :  { %1086 = vmatpush3.bf16.msra.mxu0 %v1171_v35 }
 0x13e   :  { %v975_v11 = vpop.f32.mrb[0].mxu0 }
 0x13f   :  { %v997_v12 = vpop.f32.mrb[0].mxu1  ;;  %v976_v13 = vpop.f32.mrb[1].mxu0 }
 0x140   :  { %v998_v14 = vpop.f32.mrb[1].mxu1  ;;  %v977_v15 = vadd.f32 %v976_v13, %v975_v11  ;;  %v978_v17 = vpop.f32.mrb[2].mxu0 }
 0x141   :  { %v999_v16 = vadd.f32 %v998_v14, %v997_v12  ;;  %v1000_v18 = vpop.f32.mrb[2].mxu1  ;;  %v979_v19 = vpop.f32.mrb[3].mxu0 }
 0x142   :  { %v1001_v20 = vpop.f32.mrb[3].mxu1 }
 0x143   :  { %v571_v21 = vadd.f32 %v999_v16, %v977_v15 }
 0x147   :  { %v650_v22 = vpop.f32.mrb[4].mxu1 }
 0x148   :  { %v1049_v23 = vpop.f32.mrb[5].mxu1 }
 0x149   :  { %v653_v24 = vpop.f32.mrb[6].mxu1 }
 0x14a   :  { %v1050_v25 = vpop.f32.mrb[7].mxu1 }
 0x15e   :  { %v1019_v26 = vpop.f32.mrb[4].mxu0 }
 0x15f   :  { %v1020_v27 = vpop.f32.mrb[5].mxu0 }
 0x160   :  { %v1021_v28 = vadd.f32 %v1020_v27, %v1019_v26  ;;  %v1022_v29 = vpop.f32.mrb[6].mxu0 }
 0x161   :  { %v1023_v30 = vpop.f32.mrb[7].mxu0 }
 0x162   :  { %v611_v31 = vadd.f32 %v1021_v28, %v571_v21 }
 0x164   :  { %v651_v32 = vadd.f32 %v650_v22, %v611_v31 }
 0x166   :  { %v656_v33 = vmax.f32 %v651_v32, 0.0 }
 0x168   :  { %v657_v34 = vpack.c.bf16 %v656_v33, %v656_v33 }
 0x16a   :  { %1068 = vmatmul.mubr.bf16.vlgmr.msra.gmra.mrb[8].mxu1 %v657_v34 }
 0x23d   :  { %v756_v36 = vpop.f32.mrb[8].mxu1 }
 0x23e   :  { %v762_v37 = vmax.f32 %v756_v36, 0.0  ;;  %v1069_v38 = vpop.f32.mrb[9].mxu1 }
 0x23f   :  { %v759_v39 = vpop.f32.mrb[10].mxu1 }
 0x240   :  { %v763_v40 = vpack.c.bf16 %v762_v37, %v762_v37  ;;  %v1070_v41 = vpop.f32.mrb[11].mxu1 }
 0x242   :  { %1088 = vmatmul.mubr.bf16.vlgmr.msra.gmra.mrb[8].mxu0 %v763_v40 }
 0x315   :  { %v862_v42 = vpop.f32.mrb[8].mxu0 }
 0x316   :  { %868 = vst [vmem:[#allocation10] sm:$0xff] %v862_v42  ;;  %v1089_v43 = vpop.f32.mrb[9].mxu0 }
 0x317   :  { %v865_v44 = vpop.f32.mrb[10].mxu0 }
 0x318   :  { %1271 = shalt.err (!%p1268_p8)
}
 0x319   :  { %s1272_s1 = scalar_lea.hbm %s1420_s4, 128 }
 0x31a   :  { %p1273_p9 = scmp.ne.s32.totalorder %s1420_s4, %s1272_s1  ;;  %p1276_p10 = scmp.lt.u32.totalorder %s1272_s1, %s1420_s4 }
 0x31c   :  { %p1278_p11 = pnand %p1276_p10, %p1273_p9 }
 0x31e   :  { %1281 = shalt.err (!%p1278_p11)
}
 0x31f   :  { %878 = dma.vmem_to_hbm [thread:$0]  %s876_s25, 128, %s1420_s4, [#allocation4]   ;;  %v1090_v45 = vpop.f32.mrb[11].mxu0 }
 0x320   :  { %1288 = dma.done.wait [#allocation4], 128  }
 0x321   :  { %1289 = vsyncadd [#allocation4], 4294967168 }
 0x322   :  { %882 = vsyncpa [#allocation3], 1 }
 0x323   :  { %883 = vsyncpa [#allocation6], 1 }
 0x324   :  { %884 = vsyncpa [#allocation9], 1 }
 0x325   :  { %885 = vsyncpa [#allocation4], 1 }

</bundles_post_ra>
